<compile_context>
chip_gen: v7x
topology: tpu7x:2x2x1
jax: 0.10.0
libtpu: 0.0.40
codegen_flags: <defaults>
</compile_context>

<pallas_src>
import functools

import jax
import jax.numpy as jnp
import numpy as np
from jax import lax
from jax.experimental import pallas as pl
from jax.experimental.pallas import tpu as pltpu


def _round_up(n, m):
    return -(-n // m) * m


def lstm_kernel(x_ref, wih_ref, whh_ref, b_ref, wlin_ref, blin_ref, out_ref,
                *, L, NB, H):
    """LSTM recurrence + fused (accumulated) Linear + ReLU for one batch tile.

    x_ref:    (L*NB, I)   time-major rows for this batch tile (row t*NB + n)
    wih_ref:  (I, 4H)     weight_ih_l0.T
    whh_ref:  (H, 4H)     weight_hh_l0.T
    b_ref:    (1, 4H)     bias_ih_l0 + bias_hh_l0
    wlin_ref: (L*H, OP)   linear.weight.T, lane-padded to OP (feature = t*H + h)
    blin_ref: (1, OP)     linear.bias, lane-padded
    out_ref:  (NB, OP)
    """
    # ---- Hoisted input projection: ONE GEMM for all timesteps of this tile,
    #      combined bias added once (both off the serial h-chain).
    xg = (jnp.dot(x_ref[...], wih_ref[...], preferred_element_type=jnp.float32)
          + b_ref[...])                                    # (L*NB, 4H)

    whh = whh_ref[...]                                     # reused every step
    wlin = wlin_ref[...]                                   # (L*H, OP)
    OP = wlin.shape[1]

    # ---- Recurrence: fully unrolled (L is a small compile-time constant),
    #      h / c carried in registers; only h @ W_hh is on the serial path.
    h = jnp.zeros((NB, H), jnp.float32)
    c = jnp.zeros((NB, H), jnp.float32)
    acc = jnp.zeros((NB, OP), jnp.float32)                 # fused Linear accum

    for t in range(L):                                     # static unroll
        gates = xg[t * NB:(t + 1) * NB, :] + jnp.dot(
            h, whh, preferred_element_type=jnp.float32)    # (NB, 4H)

        # One full-width sigmoid pass (EUP), then extract the gate blocks.
        sig = jax.nn.sigmoid(gates)
        i_g = sig[:, 0 * H:1 * H]
        f_g = sig[:, 1 * H:2 * H]
        o_g = sig[:, 3 * H:4 * H]
        g_g = jnp.tanh(gates[:, 2 * H:3 * H])

        c = f_g * c + i_g * g_g
        h = o_g * jnp.tanh(c)

        # Fused output Linear: accumulate this timestep's contribution.
        # (N, H) @ (H, OP) is independent of the next step's h-chain, so it
        # hides under the following step's EUP/VPU work.
        acc = acc + jnp.dot(h, wlin[t * H:(t + 1) * H, :],
                            preferred_element_type=jnp.float32)

    # ---- Bias + ReLU once, lane-dense store.
    out_ref[...] = jnp.maximum(acc + blin_ref[...], 0.0)


def lstm_model_forward(x, w_ih, w_hh, b_ih, b_hh, w_lin, b_lin):
    """Pallas wrapper reproducing LSTMModel.forward semantics.

    x:     (L, N, I) float32
    w_ih:  (4H, I),  w_hh: (4H, H),  b_ih/b_hh: (4H,)
    w_lin: (O, L*H), b_lin: (O,)
    returns (N, O) float32
    """
    L, N, I = x.shape
    H4 = w_ih.shape[0]
    H = H4 // 4
    O = w_lin.shape[0]

    # Batch tiling: NB rows per grid step (multiple of 8), grid marked parallel
    # so v7x megacore splits the batch; pad batch to a whole number of tiles.
    NB = min(128, _round_up(N, 8))
    NP = _round_up(N, NB)
    NPB = NP // NB

    # Lane-dense output: pad O (and W_lin / b_lin columns) to a multiple of 128.
    OP = _round_up(O, 128)

    # ---- Host-side layout plumbing (all handled by XLA around the call).
    x_p = jnp.pad(jnp.asarray(x, jnp.float32), ((0, 0), (0, NP - N), (0, 0)))
    # Batch-tile-major rows: tile b occupies contiguous rows [b*L*NB, (b+1)*L*NB),
    # and within a tile row index is t*NB + n (time-major, sublane-aligned).
    x2 = (x_p.reshape(L, NPB, NB, I)
              .transpose(1, 0, 2, 3)
              .reshape(NPB * L * NB, I))

    wih_t = jnp.asarray(w_ih, jnp.float32).T                    # (I, 4H)
    whh_t = jnp.asarray(w_hh, jnp.float32).T                    # (H, 4H)
    b = (jnp.asarray(b_ih, jnp.float32)
         + jnp.asarray(b_hh, jnp.float32)).reshape(1, H4)       # (1, 4H)
    wlin_t = jnp.pad(jnp.asarray(w_lin, jnp.float32).T,
                     ((0, 0), (0, OP - O)))                     # (L*H, OP)
    blin = jnp.pad(jnp.asarray(b_lin, jnp.float32),
                   (0, OP - O)).reshape(1, OP)                  # (1, OP)

    # ---- Explicit VMEM budget (per grid step, f32, with double buffering).
    resident_words = (2 * (L * NB * I            # x block (x2 buffers)
                           + I * H4 + H * H4 + H4  # weights / bias
                           + L * H * OP + OP       # linear weights / bias
                           + NB * OP)              # out block
                      + L * NB * H4                # live xg intermediate
                      + 6 * NB * H4)               # gate / cell temporaries
    vmem_limit = int(min(max(resident_words * 4 * 2, 16 * 2**20), 100 * 2**20))

    # ---- Advisory cost estimate for the XLA scheduler.
    flops = 2 * L * NP * (I * H4 + H * H4 + H * OP) + 10 * L * NP * H
    transcendentals = L * NP * (H4 + 2 * H)
    bytes_accessed = 4 * (L * NP * I + I * H4 + H * H4 + H4
                          + L * H * OP + OP + NP * OP)
    cost = pl.CostEstimate(flops=flops, transcendentals=transcendentals,
                           bytes_accessed=bytes_accessed)

    out_p = pl.pallas_call(
        functools.partial(lstm_kernel, L=L, NB=NB, H=H),
        out_shape=jax.ShapeDtypeStruct((NP, OP), jnp.float32),
        grid=(NPB,),
        in_specs=[
            pl.BlockSpec((L * NB, I), lambda b: (b, 0)),   # x, per batch tile
            pl.BlockSpec((I, H4), lambda b: (0, 0)),       # W_ih^T
            pl.BlockSpec((H, H4), lambda b: (0, 0)),       # W_hh^T
            pl.BlockSpec((1, H4), lambda b: (0, 0)),       # combined bias
            pl.BlockSpec((L * H, OP), lambda b: (0, 0)),   # W_lin^T (padded)
            pl.BlockSpec((1, OP), lambda b: (0, 0)),       # b_lin (padded)
        ],
        out_specs=pl.BlockSpec((NB, OP), lambda b: (b, 0)),
        compiler_params=pltpu.CompilerParams(
            dimension_semantics=("parallel",),
            vmem_limit_bytes=vmem_limit),
        cost_estimate=cost,
    )(x2, wih_t, whh_t, b, wlin_t, blin)

    return out_p[:N, :O]


def lstm_model_reference(x, w_ih, w_hh, b_ih, b_hh, w_lin, b_lin):
    """Pure-JAX reference (mirrors torch.nn.LSTM + Linear + ReLU)."""
    L, N, I = x.shape
    H = w_hh.shape[1]

    def step(carry, x_t):
        h, c = carry
        gates = x_t @ w_ih.T + h @ w_hh.T + b_ih + b_hh
        i_g = jax.nn.sigmoid(gates[:, 0 * H:1 * H])
        f_g = jax.nn.sigmoid(gates[:, 1 * H:2 * H])
        g_g = jnp.tanh(gates[:, 2 * H:3 * H])
        o_g = jax.nn.sigmoid(gates[:, 3 * H:4 * H])
        c = f_g * c + i_g * g_g
        h = o_g * jnp.tanh(c)
        return (h, c), h

    h0 = jnp.zeros((N, H), jnp.float32)
    c0 = jnp.zeros((N, H), jnp.float32)
    _, outputs = lax.scan(step, (h0, c0), x)            # (L, N, H)
    feat = jnp.transpose(outputs, (1, 0, 2)).reshape(N, L * H)
    return jnp.maximum(feat @ w_lin.T + b_lin, 0.0)


if __name__ == "__main__":
    # Small, forward-consistent shapes.
    input_size = 16
    hidden_size = 32
    output_size = 8
    batch_size = 2
    sequence_size = 8

    key = jax.random.PRNGKey(0)
    ks = jax.random.split(key, 7)

    # Deterministic synthetic parameters (PyTorch-style uniform(-1/sqrt(H), 1/sqrt(H))).
    bound = 1.0 / np.sqrt(hidden_size)
    w_ih = jax.random.uniform(ks[0], (4 * hidden_size, input_size),
                              jnp.float32, -bound, bound)
    w_hh = jax.random.uniform(ks[1], (4 * hidden_size, hidden_size),
                              jnp.float32, -bound, bound)
    b_ih = jax.random.uniform(ks[2], (4 * hidden_size,), jnp.float32, -bound, bound)
    b_hh = jax.random.uniform(ks[3], (4 * hidden_size,), jnp.float32, -bound, bound)

    lin_in = sequence_size * hidden_size
    lbound = 1.0 / np.sqrt(lin_in)
    w_lin = jax.random.uniform(ks[4], (output_size, lin_in),
                               jnp.float32, -lbound, lbound)
    b_lin = jax.random.uniform(ks[5], (output_size,), jnp.float32, -lbound, lbound)

    # Input: (L, N, H_in)
    x = jax.random.normal(ks[6], (sequence_size, batch_size, input_size), jnp.float32)

    out = lstm_model_forward(x, w_ih, w_hh, b_ih, b_hh, w_lin, b_lin)
    out = jax.block_until_ready(out)

    ref = jax.block_until_ready(
        lstm_model_reference(x, w_ih, w_hh, b_ih, b_hh, w_lin, b_lin))

    assert out.shape == (batch_size, output_size), out.shape
    np.testing.assert_allclose(np.asarray(out), np.asarray(ref),
                               rtol=1e-4, atol=1e-4)
    print("KERNEL_OK")
</pallas_src>

<mosaic_0001>
module attributes {stable_mosaic.version = 11 : i64} {
  func.func @lstm_kernel(%arg0: i32, %arg1: memref<64x16xf32, #tpu.memory_space<vmem>>, %arg2: memref<16x128xf32, #tpu.memory_space<vmem>>, %arg3: memref<32x128xf32, #tpu.memory_space<vmem>>, %arg4: memref<1x128xf32, #tpu.memory_space<vmem>>, %arg5: memref<256x128xf32, #tpu.memory_space<vmem>>, %arg6: memref<1x128xf32, #tpu.memory_space<vmem>>, %arg7: memref<8x128xf32, #tpu.memory_space<vmem>>) attributes {dimension_semantics = [#tpu.dimension_semantics<parallel>], iteration_bounds = array<i64: 1>, scalar_prefetch = 0 : i64, scratch_operands = 0 : i64, tpu.core_type = #tpu.core_type<tc>, window_params = [{transform_indices = @transform_0, window_bounds = array<i64: 64, 16>}, {pipeline_mode = #tpu.pipeline_mode<synchronous>, transform_indices = @transform_1, window_bounds = array<i64: 16, 128>}, {pipeline_mode = #tpu.pipeline_mode<synchronous>, transform_indices = @transform_2, window_bounds = array<i64: 32, 128>}, {pipeline_mode = #tpu.pipeline_mode<synchronous>, transform_indices = @transform_3, window_bounds = array<i64: 1, 128>}, {pipeline_mode = #tpu.pipeline_mode<synchronous>, transform_indices = @transform_4, window_bounds = array<i64: 256, 128>}, {pipeline_mode = #tpu.pipeline_mode<synchronous>, transform_indices = @transform_5, window_bounds = array<i64: 1, 128>}, {transform_indices = @transform_6, window_bounds = array<i64: 8, 128>}]} {
    %c0 = arith.constant 0 : index
    %c0_0 = arith.constant 0 : index
    %0 = vector.load %arg1[%c0, %c0_0] : memref<64x16xf32, #tpu.memory_space<vmem>>, vector<64x16xf32>
    %c0_1 = arith.constant 0 : index
    %c0_2 = arith.constant 0 : index
    %1 = vector.load %arg2[%c0_1, %c0_2] : memref<16x128xf32, #tpu.memory_space<vmem>>, vector<16x128xf32>
    %cst = arith.constant dense<0.000000e+00> : vector<64x128xf32>
    %2 = tpu.matmul %0, %1, %cst {dimension_numbers = #tpu.dot_dimension_numbers<[1], [0], [0], [1], [0, 0, 1, 1], [], []>} : vector<64x16xf32>, vector<16x128xf32>, vector<64x128xf32> -> vector<64x128xf32>
    %c0_3 = arith.constant 0 : index
    %c0_4 = arith.constant 0 : index
    %3 = vector.load %arg4[%c0_3, %c0_4] : memref<1x128xf32, #tpu.memory_space<vmem>>, vector<1x128xf32>
    %4 = vector.broadcast %3 : vector<1x128xf32> to vector<64x128xf32>
    %5 = arith.addf %2, %4 : vector<64x128xf32>
    %c0_5 = arith.constant 0 : index
    %c0_6 = arith.constant 0 : index
    %6 = vector.load %arg3[%c0_5, %c0_6] : memref<32x128xf32, #tpu.memory_space<vmem>>, vector<32x128xf32>
    %c0_7 = arith.constant 0 : index
    %c0_8 = arith.constant 0 : index
    %7 = vector.load %arg5[%c0_7, %c0_8] : memref<256x128xf32, #tpu.memory_space<vmem>>, vector<256x128xf32>
    %cst_9 = arith.constant 0.000000e+00 : f32
    %8 = vector.broadcast %cst_9 : f32 to vector<8x32xf32>
    %cst_10 = arith.constant 0.000000e+00 : f32
    %9 = vector.broadcast %cst_10 : f32 to vector<8x32xf32>
    %cst_11 = arith.constant 0.000000e+00 : f32
    %10 = vector.broadcast %cst_11 : f32 to vector<8x128xf32>
    %11 = vector.extract_strided_slice %5 {offsets = [0, 0], sizes = [8, 128], strides = [1, 1]} : vector<64x128xf32> to vector<8x128xf32>
    %cst_12 = arith.constant dense<0.000000e+00> : vector<8x128xf32>
    %12 = tpu.matmul %8, %6, %cst_12 {dimension_numbers = #tpu.dot_dimension_numbers<[1], [0], [0], [1], [0, 0, 1, 1], [], []>} : vector<8x32xf32>, vector<32x128xf32>, vector<8x128xf32> -> vector<8x128xf32>
    %13 = arith.addf %11, %12 : vector<8x128xf32>
    %14 = arith.negf %13 : vector<8x128xf32>
    %15 = math.exp %14 : vector<8x128xf32>
    %cst_13 = arith.constant 1.000000e+00 : f32
    %16 = vector.broadcast %cst_13 : f32 to vector<8x128xf32>
    %17 = arith.addf %16, %15 : vector<8x128xf32>
    %18 = arith.divf %16, %17 : vector<8x128xf32>
    %19 = vector.extract_strided_slice %18 {offsets = [0, 0], sizes = [8, 32], strides = [1, 1]} : vector<8x128xf32> to vector<8x32xf32>
    %20 = vector.extract_strided_slice %18 {offsets = [0, 32], sizes = [8, 32], strides = [1, 1]} : vector<8x128xf32> to vector<8x32xf32>
    %21 = vector.extract_strided_slice %18 {offsets = [0, 96], sizes = [8, 32], strides = [1, 1]} : vector<8x128xf32> to vector<8x32xf32>
    %22 = vector.extract_strided_slice %13 {offsets = [0, 64], sizes = [8, 32], strides = [1, 1]} : vector<8x128xf32> to vector<8x32xf32>
    %23 = math.tanh %22 : vector<8x32xf32>
    %24 = arith.mulf %20, %9 : vector<8x32xf32>
    %25 = arith.mulf %19, %23 : vector<8x32xf32>
    %26 = arith.addf %24, %25 : vector<8x32xf32>
    %27 = math.tanh %26 : vector<8x32xf32>
    %28 = arith.mulf %21, %27 : vector<8x32xf32>
    %29 = vector.extract_strided_slice %7 {offsets = [0, 0], sizes = [32, 128], strides = [1, 1]} : vector<256x128xf32> to vector<32x128xf32>
    %cst_14 = arith.constant dense<0.000000e+00> : vector<8x128xf32>
    %30 = tpu.matmul %28, %29, %cst_14 {dimension_numbers = #tpu.dot_dimension_numbers<[1], [0], [0], [1], [0, 0, 1, 1], [], []>} : vector<8x32xf32>, vector<32x128xf32>, vector<8x128xf32> -> vector<8x128xf32>
    %31 = arith.addf %10, %30 : vector<8x128xf32>
    %32 = vector.extract_strided_slice %5 {offsets = [8, 0], sizes = [8, 128], strides = [1, 1]} : vector<64x128xf32> to vector<8x128xf32>
    %cst_15 = arith.constant dense<0.000000e+00> : vector<8x128xf32>
    %33 = tpu.matmul %28, %6, %cst_15 {dimension_numbers = #tpu.dot_dimension_numbers<[1], [0], [0], [1], [0, 0, 1, 1], [], []>} : vector<8x32xf32>, vector<32x128xf32>, vector<8x128xf32> -> vector<8x128xf32>
    %34 = arith.addf %32, %33 : vector<8x128xf32>
    %35 = arith.negf %34 : vector<8x128xf32>
    %36 = math.exp %35 : vector<8x128xf32>
    %cst_16 = arith.constant 1.000000e+00 : f32
    %37 = vector.broadcast %cst_16 : f32 to vector<8x128xf32>
    %38 = arith.addf %37, %36 : vector<8x128xf32>
    %39 = arith.divf %37, %38 : vector<8x128xf32>
    %40 = vector.extract_strided_slice %39 {offsets = [0, 0], sizes = [8, 32], strides = [1, 1]} : vector<8x128xf32> to vector<8x32xf32>
    %41 = vector.extract_strided_slice %39 {offsets = [0, 32], sizes = [8, 32], strides = [1, 1]} : vector<8x128xf32> to vector<8x32xf32>
    %42 = vector.extract_strided_slice %39 {offsets = [0, 96], sizes = [8, 32], strides = [1, 1]} : vector<8x128xf32> to vector<8x32xf32>
    %43 = vector.extract_strided_slice %34 {offsets = [0, 64], sizes = [8, 32], strides = [1, 1]} : vector<8x128xf32> to vector<8x32xf32>
    %44 = math.tanh %43 : vector<8x32xf32>
    %45 = arith.mulf %41, %26 : vector<8x32xf32>
    %46 = arith.mulf %40, %44 : vector<8x32xf32>
    %47 = arith.addf %45, %46 : vector<8x32xf32>
    %48 = math.tanh %47 : vector<8x32xf32>
    %49 = arith.mulf %42, %48 : vector<8x32xf32>
    %50 = vector.extract_strided_slice %7 {offsets = [32, 0], sizes = [32, 128], strides = [1, 1]} : vector<256x128xf32> to vector<32x128xf32>
    %cst_17 = arith.constant dense<0.000000e+00> : vector<8x128xf32>
    %51 = tpu.matmul %49, %50, %cst_17 {dimension_numbers = #tpu.dot_dimension_numbers<[1], [0], [0], [1], [0, 0, 1, 1], [], []>} : vector<8x32xf32>, vector<32x128xf32>, vector<8x128xf32> -> vector<8x128xf32>
    %52 = arith.addf %31, %51 : vector<8x128xf32>
    %53 = vector.extract_strided_slice %5 {offsets = [16, 0], sizes = [8, 128], strides = [1, 1]} : vector<64x128xf32> to vector<8x128xf32>
    %cst_18 = arith.constant dense<0.000000e+00> : vector<8x128xf32>
    %54 = tpu.matmul %49, %6, %cst_18 {dimension_numbers = #tpu.dot_dimension_numbers<[1], [0], [0], [1], [0, 0, 1, 1], [], []>} : vector<8x32xf32>, vector<32x128xf32>, vector<8x128xf32> -> vector<8x128xf32>
    %55 = arith.addf %53, %54 : vector<8x128xf32>
    %56 = arith.negf %55 : vector<8x128xf32>
    %57 = math.exp %56 : vector<8x128xf32>
    %cst_19 = arith.constant 1.000000e+00 : f32
    %58 = vector.broadcast %cst_19 : f32 to vector<8x128xf32>
    %59 = arith.addf %58, %57 : vector<8x128xf32>
    %60 = arith.divf %58, %59 : vector<8x128xf32>
    %61 = vector.extract_strided_slice %60 {offsets = [0, 0], sizes = [8, 32], strides = [1, 1]} : vector<8x128xf32> to vector<8x32xf32>
    %62 = vector.extract_strided_slice %60 {offsets = [0, 32], sizes = [8, 32], strides = [1, 1]} : vector<8x128xf32> to vector<8x32xf32>
    %63 = vector.extract_strided_slice %60 {offsets = [0, 96], sizes = [8, 32], strides = [1, 1]} : vector<8x128xf32> to vector<8x32xf32>
    %64 = vector.extract_strided_slice %55 {offsets = [0, 64], sizes = [8, 32], strides = [1, 1]} : vector<8x128xf32> to vector<8x32xf32>
    %65 = math.tanh %64 : vector<8x32xf32>
    %66 = arith.mulf %62, %47 : vector<8x32xf32>
    %67 = arith.mulf %61, %65 : vector<8x32xf32>
    %68 = arith.addf %66, %67 : vector<8x32xf32>
    %69 = math.tanh %68 : vector<8x32xf32>
    %70 = arith.mulf %63, %69 : vector<8x32xf32>
    %71 = vector.extract_strided_slice %7 {offsets = [64, 0], sizes = [32, 128], strides = [1, 1]} : vector<256x128xf32> to vector<32x128xf32>
    %cst_20 = arith.constant dense<0.000000e+00> : vector<8x128xf32>
    %72 = tpu.matmul %70, %71, %cst_20 {dimension_numbers = #tpu.dot_dimension_numbers<[1], [0], [0], [1], [0, 0, 1, 1], [], []>} : vector<8x32xf32>, vector<32x128xf32>, vector<8x128xf32> -> vector<8x128xf32>
    %73 = arith.addf %52, %72 : vector<8x128xf32>
    %74 = vector.extract_strided_slice %5 {offsets = [24, 0], sizes = [8, 128], strides = [1, 1]} : vector<64x128xf32> to vector<8x128xf32>
    %cst_21 = arith.constant dense<0.000000e+00> : vector<8x128xf32>
    %75 = tpu.matmul %70, %6, %cst_21 {dimension_numbers = #tpu.dot_dimension_numbers<[1], [0], [0], [1], [0, 0, 1, 1], [], []>} : vector<8x32xf32>, vector<32x128xf32>, vector<8x128xf32> -> vector<8x128xf32>
    %76 = arith.addf %74, %75 : vector<8x128xf32>
    %77 = arith.negf %76 : vector<8x128xf32>
    %78 = math.exp %77 : vector<8x128xf32>
    %cst_22 = arith.constant 1.000000e+00 : f32
    %79 = vector.broadcast %cst_22 : f32 to vector<8x128xf32>
    %80 = arith.addf %79, %78 : vector<8x128xf32>
    %81 = arith.divf %79, %80 : vector<8x128xf32>
    %82 = vector.extract_strided_slice %81 {offsets = [0, 0], sizes = [8, 32], strides = [1, 1]} : vector<8x128xf32> to vector<8x32xf32>
    %83 = vector.extract_strided_slice %81 {offsets = [0, 32], sizes = [8, 32], strides = [1, 1]} : vector<8x128xf32> to vector<8x32xf32>
    %84 = vector.extract_strided_slice %81 {offsets = [0, 96], sizes = [8, 32], strides = [1, 1]} : vector<8x128xf32> to vector<8x32xf32>
    %85 = vector.extract_strided_slice %76 {offsets = [0, 64], sizes = [8, 32], strides = [1, 1]} : vector<8x128xf32> to vector<8x32xf32>
    %86 = math.tanh %85 : vector<8x32xf32>
    %87 = arith.mulf %83, %68 : vector<8x32xf32>
    %88 = arith.mulf %82, %86 : vector<8x32xf32>
    %89 = arith.addf %87, %88 : vector<8x32xf32>
    %90 = math.tanh %89 : vector<8x32xf32>
    %91 = arith.mulf %84, %90 : vector<8x32xf32>
    %92 = vector.extract_strided_slice %7 {offsets = [96, 0], sizes = [32, 128], strides = [1, 1]} : vector<256x128xf32> to vector<32x128xf32>
    %cst_23 = arith.constant dense<0.000000e+00> : vector<8x128xf32>
    %93 = tpu.matmul %91, %92, %cst_23 {dimension_numbers = #tpu.dot_dimension_numbers<[1], [0], [0], [1], [0, 0, 1, 1], [], []>} : vector<8x32xf32>, vector<32x128xf32>, vector<8x128xf32> -> vector<8x128xf32>
    %94 = arith.addf %73, %93 : vector<8x128xf32>
    %95 = vector.extract_strided_slice %5 {offsets = [32, 0], sizes = [8, 128], strides = [1, 1]} : vector<64x128xf32> to vector<8x128xf32>
    %cst_24 = arith.constant dense<0.000000e+00> : vector<8x128xf32>
    %96 = tpu.matmul %91, %6, %cst_24 {dimension_numbers = #tpu.dot_dimension_numbers<[1], [0], [0], [1], [0, 0, 1, 1], [], []>} : vector<8x32xf32>, vector<32x128xf32>, vector<8x128xf32> -> vector<8x128xf32>
    %97 = arith.addf %95, %96 : vector<8x128xf32>
    %98 = arith.negf %97 : vector<8x128xf32>
    %99 = math.exp %98 : vector<8x128xf32>
    %cst_25 = arith.constant 1.000000e+00 : f32
    %100 = vector.broadcast %cst_25 : f32 to vector<8x128xf32>
    %101 = arith.addf %100, %99 : vector<8x128xf32>
    %102 = arith.divf %100, %101 : vector<8x128xf32>
    %103 = vector.extract_strided_slice %102 {offsets = [0, 0], sizes = [8, 32], strides = [1, 1]} : vector<8x128xf32> to vector<8x32xf32>
    %104 = vector.extract_strided_slice %102 {offsets = [0, 32], sizes = [8, 32], strides = [1, 1]} : vector<8x128xf32> to vector<8x32xf32>
    %105 = vector.extract_strided_slice %102 {offsets = [0, 96], sizes = [8, 32], strides = [1, 1]} : vector<8x128xf32> to vector<8x32xf32>
    %106 = vector.extract_strided_slice %97 {offsets = [0, 64], sizes = [8, 32], strides = [1, 1]} : vector<8x128xf32> to vector<8x32xf32>
    %107 = math.tanh %106 : vector<8x32xf32>
    %108 = arith.mulf %104, %89 : vector<8x32xf32>
    %109 = arith.mulf %103, %107 : vector<8x32xf32>
    %110 = arith.addf %108, %109 : vector<8x32xf32>
    %111 = math.tanh %110 : vector<8x32xf32>
    %112 = arith.mulf %105, %111 : vector<8x32xf32>
    %113 = vector.extract_strided_slice %7 {offsets = [128, 0], sizes = [32, 128], strides = [1, 1]} : vector<256x128xf32> to vector<32x128xf32>
    %cst_26 = arith.constant dense<0.000000e+00> : vector<8x128xf32>
    %114 = tpu.matmul %112, %113, %cst_26 {dimension_numbers = #tpu.dot_dimension_numbers<[1], [0], [0], [1], [0, 0, 1, 1], [], []>} : vector<8x32xf32>, vector<32x128xf32>, vector<8x128xf32> -> vector<8x128xf32>
    %115 = arith.addf %94, %114 : vector<8x128xf32>
    %116 = vector.extract_strided_slice %5 {offsets = [40, 0], sizes = [8, 128], strides = [1, 1]} : vector<64x128xf32> to vector<8x128xf32>
    %cst_27 = arith.constant dense<0.000000e+00> : vector<8x128xf32>
    %117 = tpu.matmul %112, %6, %cst_27 {dimension_numbers = #tpu.dot_dimension_numbers<[1], [0], [0], [1], [0, 0, 1, 1], [], []>} : vector<8x32xf32>, vector<32x128xf32>, vector<8x128xf32> -> vector<8x128xf32>
    %118 = arith.addf %116, %117 : vector<8x128xf32>
    %119 = arith.negf %118 : vector<8x128xf32>
    %120 = math.exp %119 : vector<8x128xf32>
    %cst_28 = arith.constant 1.000000e+00 : f32
    %121 = vector.broadcast %cst_28 : f32 to vector<8x128xf32>
    %122 = arith.addf %121, %120 : vector<8x128xf32>
    %123 = arith.divf %121, %122 : vector<8x128xf32>
    %124 = vector.extract_strided_slice %123 {offsets = [0, 0], sizes = [8, 32], strides = [1, 1]} : vector<8x128xf32> to vector<8x32xf32>
    %125 = vector.extract_strided_slice %123 {offsets = [0, 32], sizes = [8, 32], strides = [1, 1]} : vector<8x128xf32> to vector<8x32xf32>
    %126 = vector.extract_strided_slice %123 {offsets = [0, 96], sizes = [8, 32], strides = [1, 1]} : vector<8x128xf32> to vector<8x32xf32>
    %127 = vector.extract_strided_slice %118 {offsets = [0, 64], sizes = [8, 32], strides = [1, 1]} : vector<8x128xf32> to vector<8x32xf32>
    %128 = math.tanh %127 : vector<8x32xf32>
    %129 = arith.mulf %125, %110 : vector<8x32xf32>
    %130 = arith.mulf %124, %128 : vector<8x32xf32>
    %131 = arith.addf %129, %130 : vector<8x32xf32>
    %132 = math.tanh %131 : vector<8x32xf32>
    %133 = arith.mulf %126, %132 : vector<8x32xf32>
    %134 = vector.extract_strided_slice %7 {offsets = [160, 0], sizes = [32, 128], strides = [1, 1]} : vector<256x128xf32> to vector<32x128xf32>
    %cst_29 = arith.constant dense<0.000000e+00> : vector<8x128xf32>
    %135 = tpu.matmul %133, %134, %cst_29 {dimension_numbers = #tpu.dot_dimension_numbers<[1], [0], [0], [1], [0, 0, 1, 1], [], []>} : vector<8x32xf32>, vector<32x128xf32>, vector<8x128xf32> -> vector<8x128xf32>
    %136 = arith.addf %115, %135 : vector<8x128xf32>
    %137 = vector.extract_strided_slice %5 {offsets = [48, 0], sizes = [8, 128], strides = [1, 1]} : vector<64x128xf32> to vector<8x128xf32>
    %cst_30 = arith.constant dense<0.000000e+00> : vector<8x128xf32>
    %138 = tpu.matmul %133, %6, %cst_30 {dimension_numbers = #tpu.dot_dimension_numbers<[1], [0], [0], [1], [0, 0, 1, 1], [], []>} : vector<8x32xf32>, vector<32x128xf32>, vector<8x128xf32> -> vector<8x128xf32>
    %139 = arith.addf %137, %138 : vector<8x128xf32>
    %140 = arith.negf %139 : vector<8x128xf32>
    %141 = math.exp %140 : vector<8x128xf32>
    %cst_31 = arith.constant 1.000000e+00 : f32
    %142 = vector.broadcast %cst_31 : f32 to vector<8x128xf32>
    %143 = arith.addf %142, %141 : vector<8x128xf32>
    %144 = arith.divf %142, %143 : vector<8x128xf32>
    %145 = vector.extract_strided_slice %144 {offsets = [0, 0], sizes = [8, 32], strides = [1, 1]} : vector<8x128xf32> to vector<8x32xf32>
    %146 = vector.extract_strided_slice %144 {offsets = [0, 32], sizes = [8, 32], strides = [1, 1]} : vector<8x128xf32> to vector<8x32xf32>
    %147 = vector.extract_strided_slice %144 {offsets = [0, 96], sizes = [8, 32], strides = [1, 1]} : vector<8x128xf32> to vector<8x32xf32>
    %148 = vector.extract_strided_slice %139 {offsets = [0, 64], sizes = [8, 32], strides = [1, 1]} : vector<8x128xf32> to vector<8x32xf32>
    %149 = math.tanh %148 : vector<8x32xf32>
    %150 = arith.mulf %146, %131 : vector<8x32xf32>
    %151 = arith.mulf %145, %149 : vector<8x32xf32>
    %152 = arith.addf %150, %151 : vector<8x32xf32>
    %153 = math.tanh %152 : vector<8x32xf32>
    %154 = arith.mulf %147, %153 : vector<8x32xf32>
    %155 = vector.extract_strided_slice %7 {offsets = [192, 0], sizes = [32, 128], strides = [1, 1]} : vector<256x128xf32> to vector<32x128xf32>
    %cst_32 = arith.constant dense<0.000000e+00> : vector<8x128xf32>
    %156 = tpu.matmul %154, %155, %cst_32 {dimension_numbers = #tpu.dot_dimension_numbers<[1], [0], [0], [1], [0, 0, 1, 1], [], []>} : vector<8x32xf32>, vector<32x128xf32>, vector<8x128xf32> -> vector<8x128xf32>
    %157 = arith.addf %136, %156 : vector<8x128xf32>
    %158 = vector.extract_strided_slice %5 {offsets = [56, 0], sizes = [8, 128], strides = [1, 1]} : vector<64x128xf32> to vector<8x128xf32>
    %cst_33 = arith.constant dense<0.000000e+00> : vector<8x128xf32>
    %159 = tpu.matmul %154, %6, %cst_33 {dimension_numbers = #tpu.dot_dimension_numbers<[1], [0], [0], [1], [0, 0, 1, 1], [], []>} : vector<8x32xf32>, vector<32x128xf32>, vector<8x128xf32> -> vector<8x128xf32>
    %160 = arith.addf %158, %159 : vector<8x128xf32>
    %161 = arith.negf %160 : vector<8x128xf32>
    %162 = math.exp %161 : vector<8x128xf32>
    %cst_34 = arith.constant 1.000000e+00 : f32
    %163 = vector.broadcast %cst_34 : f32 to vector<8x128xf32>
    %164 = arith.addf %163, %162 : vector<8x128xf32>
    %165 = arith.divf %163, %164 : vector<8x128xf32>
    %166 = vector.extract_strided_slice %165 {offsets = [0, 0], sizes = [8, 32], strides = [1, 1]} : vector<8x128xf32> to vector<8x32xf32>
    %167 = vector.extract_strided_slice %165 {offsets = [0, 32], sizes = [8, 32], strides = [1, 1]} : vector<8x128xf32> to vector<8x32xf32>
    %168 = vector.extract_strided_slice %165 {offsets = [0, 96], sizes = [8, 32], strides = [1, 1]} : vector<8x128xf32> to vector<8x32xf32>
    %169 = vector.extract_strided_slice %160 {offsets = [0, 64], sizes = [8, 32], strides = [1, 1]} : vector<8x128xf32> to vector<8x32xf32>
    %170 = math.tanh %169 : vector<8x32xf32>
    %171 = arith.mulf %167, %152 : vector<8x32xf32>
    %172 = arith.mulf %166, %170 : vector<8x32xf32>
    %173 = arith.addf %171, %172 : vector<8x32xf32>
    %174 = math.tanh %173 : vector<8x32xf32>
    %175 = arith.mulf %168, %174 : vector<8x32xf32>
    %176 = vector.extract_strided_slice %7 {offsets = [224, 0], sizes = [32, 128], strides = [1, 1]} : vector<256x128xf32> to vector<32x128xf32>
    %cst_35 = arith.constant dense<0.000000e+00> : vector<8x128xf32>
    %177 = tpu.matmul %175, %176, %cst_35 {dimension_numbers = #tpu.dot_dimension_numbers<[1], [0], [0], [1], [0, 0, 1, 1], [], []>} : vector<8x32xf32>, vector<32x128xf32>, vector<8x128xf32> -> vector<8x128xf32>
    %178 = arith.addf %157, %177 : vector<8x128xf32>
    %c0_36 = arith.constant 0 : index
    %c0_37 = arith.constant 0 : index
    %179 = vector.load %arg6[%c0_36, %c0_37] : memref<1x128xf32, #tpu.memory_space<vmem>>, vector<1x128xf32>
    %180 = vector.broadcast %179 : vector<1x128xf32> to vector<8x128xf32>
    %181 = arith.addf %178, %180 : vector<8x128xf32>
    %cst_38 = arith.constant 0.000000e+00 : f32
    %182 = vector.broadcast %cst_38 : f32 to vector<8x128xf32>
    %183 = arith.maximumf %181, %182 : vector<8x128xf32>
    %c0_39 = arith.constant 0 : index
    %c0_40 = arith.constant 0 : index
    %184 = vector.load %arg7[%c0_39, %c0_40] : memref<8x128xf32, #tpu.memory_space<vmem>>, vector<8x128xf32>
    tpu.vector_store %arg7[%c0_39, %c0_40], %183 {strides = array<i32>} : memref<8x128xf32, #tpu.memory_space<vmem>>, vector<8x128xf32>,
    return
  }
  func.func @transform_0(%arg0: i32) -> (i32, i32) {
    %c0_i32 = arith.constant 0 : i32
    %c0_i32_0 = arith.constant 0 : i32
    return %arg0, %c0_i32 : i32, i32
  }
  func.func @transform_1(%arg0: i32) -> (i32, i32) {
    %c0_i32 = arith.constant 0 : i32
    %c0_i32_0 = arith.constant 0 : i32
    %c0_i32_1 = arith.constant 0 : i32
    return %c0_i32, %c0_i32_0 : i32, i32
  }
  func.func @transform_2(%arg0: i32) -> (i32, i32) {
    %c0_i32 = arith.constant 0 : i32
    %c0_i32_0 = arith.constant 0 : i32
    %c0_i32_1 = arith.constant 0 : i32
    return %c0_i32, %c0_i32_0 : i32, i32
  }
  func.func @transform_3(%arg0: i32) -> (i32, i32) {
    %c0_i32 = arith.constant 0 : i32
    %c0_i32_0 = arith.constant 0 : i32
    %c0_i32_1 = arith.constant 0 : i32
    return %c0_i32, %c0_i32_0 : i32, i32
  }
  func.func @transform_4(%arg0: i32) -> (i32, i32) {
    %c0_i32 = arith.constant 0 : i32
    %c0_i32_0 = arith.constant 0 : i32
    %c0_i32_1 = arith.constant 0 : i32
    return %c0_i32, %c0_i32_0 : i32, i32
  }
  func.func @transform_5(%arg0: i32) -> (i32, i32) {
    %c0_i32 = arith.constant 0 : i32
    %c0_i32_0 = arith.constant 0 : i32
    %c0_i32_1 = arith.constant 0 : i32
    return %c0_i32, %c0_i32_0 : i32, i32
  }
  func.func @transform_6(%arg0: i32) -> (i32, i32) {
    %c0_i32 = arith.constant 0 : i32
    %c0_i32_0 = arith.constant 0 : i32
    return %arg0, %c0_i32 : i32, i32
  }
}

</mosaic_0001>

<bundles_post_ra>
// kernel: tpu_custom_call.1
= control target key start
LH: loop header
LB: loop body
LE: loop exit
PB: predicated region body
PF: predicated region fallthrough
CT: control target
= control target key end

     0   :  { %11 = vsyncpa [#allocation3], 0  ;;  %s2440_s0 = inlined_call_operand.vmem [shape: f32[64,16], index: 0, kind: input, shape index: {}]   ;;  %s2441_s1 = inlined_call_operand.vmem [shape: f32[16,128], index: 1, kind: input, shape index: {}]   ;;  %s2442_s2 = inlined_call_operand.vmem [shape: f32[32,128], index: 2, kind: input, shape index: {}]   ;;  %s2443_s3 = inlined_call_operand.vmem [shape: f32[1,128], index: 3, kind: input, shape index: {}]   ;;  %s2444_s4 = inlined_call_operand.hbm [shape: f32[256,128], index: 4, kind: input, shape index: {}]   ;;  %s2445_s5 = inlined_call_operand.vmem [shape: f32[1,128], index: 5, kind: input, shape index: {}]   ;;  %s2446_s6 = inlined_call_operand.hbm [shape: f32[8,128], index: 6, kind: output, shape index: {}]  }
   0x1   :  { %12 = vsyncpa [#allocation4], 0  ;;  %s2152_s21 = smov [#allocation2]   ;;  %s2104_s25 = scalar_lea.hbm %s2444_s4, 4096 }
   0x2   :  { %s26_s22 = sshll.u32 %s2152_s21, 4  ;;  %p2105_p0 = scmp.ne.s32.totalorder %s2444_s4, %s2104_s25  ;;  %s27_s22 = int_to_ptr.vmem [resolvable:$true] %s26_s22 }
   0x3   :  { %p2108_p1 = scmp.lt.u32.totalorder %s2104_s25, %s2444_s4 }
   0x5   :  { %p2110_p2 = pnand %p2108_p1, %p2105_p0 }
   0x7   :  { %2113 = shalt.err (!%p2110_p2)
}
   0x8   :  { %s2114_s30 = scalar_lea.vmem %s27_s22, 4096  ;;  %p2119_p4 = scmp.lt.s32.totalorder %s27_s22, %s27_s22 }
   0x9   :  { %p2115_p3 = scmp.ne.s32.totalorder %s27_s22, %s2114_s30  ;;  %p2120_p5 = scmp.lt.s32.totalorder %s2114_s30, %s2114_s30 }
   0xb   :  { %p2121_p6 = por %p2120_p5, %p2119_p4 }
   0xd   :  { %p2122_p7 = pnand %p2121_p6, %p2115_p3 }
   0xf   :  { %2125 = shalt.err (!%p2122_p7)
}
  0x10   :  { %s2153_s7 = smov 128   ;;  %s2154_s8 = smov 8  }
  0x11   :  { %32 = dma.hbm_to_vmem [thread:$0]  %s2444_s4, 4096, %s27_s22, [#allocation3], %s2153_s7, %s2153_s7, %s2154_s8  }
  0x12   :  { %2148 = dma.done.wait [#allocation3], 4096  }
  0x13   :  { %2149 = vsyncadd [#allocation3], 4294963200  ;;  %v2155_v0 = vmov 0.0|0.0   ;;  %vm2156_vm0 = vmmov 0   ;;  %v2157_v1 = vmov 0.0   ;;  %vm55_vm1 = vcmask 130048  }
  0x14   :  { %1935 = vmatprep.subr.bf16.mxu1 %v2155_v0  ;;  %1763 = vmatprep.mubr.msk.f32.mxu1 %vm2156_vm0, %v2157_v1  ;;  %v46_v2 = vld [vmem:[%s2441_s1] sm:$0xff]  ;;  %v47_v3 = vld [vmem:[%s2441_s1 + $0x8] sm:$0xff]  ;;  %v187_v9 = vld [vmem:[%s2442_s2 + $0x10] sm:$0xff]  ;;  %s2158_s26 = smov 64   ;;  %vm221_vm2 = vcmask 261120   ;;  %s2160_s15 = smov [#allocation5]  }
  0x15   :  { %v185_v4 = vld [vmem:[%s2442_s2] sm:$0xff]  ;;  %v1931_v5 = vpack.c.bf16 %v47_v3, %v46_v2  ;;  %v186_v6 = vld [vmem:[%s2442_s2 + $0x8] sm:$0xff]  ;;  %v188_v10 = vld [vmem:[%s2442_s2 + $0x18] sm:$0xff]  ;;  %s1607_s16 = sshll.u32 %s2160_s15, 4  ;;  %s1608_s16 = int_to_ptr.vmem [resolvable:$true] %s1607_s16 }
  0x16   :  { %v38_v7 = vld [vmem:[%s2440_s0] sm:$0xff]  ;;  %v2226_v8 = vpack.c.bf16 %v186_v6, %v185_v4  ;;  %v39_v11 = vld [vmem:[%s2440_s0 + $0x8] sm:$0xff]  ;;  %v2239_v12 = vpack.c.bf16 %v188_v10, %v187_v9  ;;  %v191_v36 = vld [vmem:[#allocation2 + $0x10] sm:$0xff]  ;;  %s2126_s17 = scalar_lea.vmem %s1608_s16, 128  ;;  %p2131_p9 = scmp.lt.s32.totalorder %s1608_s16, %s1608_s16 }
  0x17   :  { %1743 = vmatprep.mubr.msk.f32.mxu0 %vm55_vm1, %v38_v7  ;;  %1932 = vmatprep.subr.bf16.mxu0 %v1931_v5  ;;  %v2256_v13 = vld [vmem:[%s2443_s3] ss:$0 sm:$0xff]  ;;  %s2159_s3 = smov 32   ;;  %v190_v34 = vld [vmem:[#allocation2 + $0x8] sm:$0xff]  ;;  %v192_v37 = vld [vmem:[#allocation2 + $0x18] sm:$0xff]  ;;  %p2127_p8 = scmp.ne.s32.totalorder %s1608_s16, %s2126_s17 }
  0x18   :  { %1937 = vmatpush3.bf16.msra.mxu1 %v2226_v8  ;;  %1934 = vmatpush3.bf16.msra.mxu0 %v1931_v5  ;;  %v189_v33 = vld [vmem:[#allocation2] sm:$0xff]  ;;  %v1957_v39 = vpack.c.bf16 %v192_v37, %v191_v36  ;;  %v194_v57 = vld [vmem:[#allocation2 + $0x28] sm:$0xff]  ;;  %v40_v58 = vld [vmem:[%s2440_s0 + $0x10] sm:$0xff]  ;;  %p2132_p10 = scmp.lt.s32.totalorder %s2126_s17, %s2126_s17 }
  0x19   :  { %1938 = vmatprep.subr.bf16.mxu1 %v2155_v0  ;;  %1947 = vmatprep.subr.bf16.mxu0 %v2155_v0  ;;  %v1954_v35 = vpack.c.bf16 %v190_v34, %v189_v33  ;;  %v193_v56 = vld [vmem:[#allocation2 + $0x20] sm:$0xff]  ;;  %v41_v60 = vld [vmem:[%s2440_s0 + $0x18] sm:$0xff]  ;;  %v195_v62 = vld [vmem:[#allocation2 + $0x30] sm:$0xff] }
  0x1a   :  { %v1948_v59 = vpack.c.bf16 %v194_v57, %v193_v56  ;;  %v42_v61 = vld [vmem:[%s2440_s0 + $0x20] sm:$0xff]  ;;  %v196_v63 = vld [vmem:[#allocation2 + $0x38] sm:$0xff]  ;;  %v43_v2 = vld [vmem:[%s2440_s0 + $0x28] sm:$0xff]  ;;  %p2133_p11 = por %p2132_p10, %p2131_p9 }
  0x1b   :  { %1744 = vmatmul.mubr.msk.f32.vlgmr.msra.gmra.mrb[0].mxu0 %vm55_vm1, %v39_v11  ;;  %v1951_v3 = vpack.c.bf16 %v196_v63, %v195_v62  ;;  %v44_v4 = vld [vmem:[%s2440_s0 + $0x30] sm:$0xff]  ;;  %v45_v5 = vld [vmem:[%s2440_s0 + $0x38] sm:$0xff]  ;;  %v197_v36 = vld [vmem:[#allocation2 + $0x40] sm:$0xff] }
  0x1c   :  { %1940 = vmatpush3.bf16.msra.mxu1 %v2239_v12  ;;  %1746 = vmatprep.mubr.msk.f32.mxu0 %vm55_vm1, %v40_v58  ;;  %v198_v37 = vld [vmem:[#allocation2 + $0x48] sm:$0xff]  ;;  %v201_v63 = vld [vmem:[#allocation2 + $0x60] sm:$0xff]  ;;  %p2134_p12 = pnand %p2133_p11, %p2127_p8 }
  0x1d   :  { %1941 = vmatprep.subr.bf16.mxu1 %v2155_v0  ;;  %1949 = vmatpush3.bf16.msra.mxu0 %v1948_v59 }
  0x1e   :  { %1950 = vmatprep.subr.bf16.mxu0 %v2155_v0 }
  0x1f   :  { %1764 = vmatmul.mubr.f32.vlgmr.msra.gmra.mrb[0].mxu1 %v2157_v1  ;;  %1747 = vmatmul.mubr.msk.f32.gmra.mrb[2].mxu0 %vm55_vm1, %v41_v60 }
  0x20   :  { %1943 = vmatpush3.bf16.msra.mxu1 %v2226_v8  ;;  %1774 = vmatprep.mubr.msk.f32.mxu1 %vm2156_vm0, %v2157_v1 }
  0x21   :  { %1944 = vmatprep.subr.bf16.mxu1 %v2155_v0  ;;  %1749 = vmatprep.mubr.msk.f32.mxu0 %vm55_vm1, %v42_v61 }
  0x22   :  { %1952 = vmatpush3.bf16.msra.mxu0 %v1951_v3  ;;  %v203_v3 = vld [vmem:[#allocation2 + $0x70] sm:$0xff] }
  0x23   :  { %1750 = vmatmul.mubr.msk.f32.gmra.mrb[4].mxu0 %vm55_vm1, %v43_v2  ;;  %1959 = vmatprep.subr.bf16.mxu0 %v2155_v0  ;;  %v202_v2 = vld [vmem:[#allocation2 + $0x68] sm:$0xff] }
  0x24   :  { %1946 = vmatpush3.bf16.msra.mxu1 %v2239_v12  ;;  %1752 = vmatprep.mubr.msk.f32.mxu0 %vm55_vm1, %v44_v4  ;;  %v1978_v4 = vpack.c.bf16 %v202_v2, %v201_v63  ;;  %v212_v2 = vld [vmem:[#allocation2 + $0xb8] sm:$0xff] }
  0x25   :  { %1953 = vmatprep.subr.bf16.mxu1 %v2155_v0 }
  0x27   :  { %1753 = vmatmul.mubr.msk.f32.gmra.mrb[6].mxu0 %vm55_vm1, %v45_v5  ;;  %v204_v5 = vld [vmem:[#allocation2 + $0x78] sm:$0xff] }
  0x28   :  { %1785 = vmatprep.mubr.msk.f32.mxu0 %vm2156_vm0, %v2157_v1 }
  0xee   :  { %v1745_v14 = vpop.f32.mrb[0].mxu0 }
  0xef   :  { %v146_v15 = vpop.f32.mrb[1].mxu0  ;;  %v152_v40 = vadd.f32 %v1745_v14, %v2256_v13 }
  0xf0   :  { %v147_v16 = vadd.f32 %v2256_v13, %v146_v15 }
  0xf2   :  { %v291_v17 = vpop.f32.mrb[0].mxu1  ;;  %v2309_v10 = vpop.f32.mrb[2].mxu0 }
  0xf3   :  { %v295_v18 = vadd.f32 %v291_v17, %v147_v16  ;;  %v1765_v19 = vpop.f32.mrb[1].mxu1  ;;  %v156_v11 = vpop.f32.mrb[3].mxu0 }
  0xf5   :  { %2040 = vtanh.f32 %v295_v18  ;;  %v1625_v21 = vmul.f32 -1.442695, %v295_v18 }
  0xf6   :  { %v2311_v14 = vpop.f32.mrb[4].mxu0 }
  0xf7   :  { %2042 = vpow2.f32 %v1625_v21  ;;  %v2313_v15 = vpop.f32.mrb[5].mxu0 }
  0xfa   :  { %v2315_v16 = vpop.f32.mrb[6].mxu0 }
  0xfb   :  { %v2317_v17 = vpop.f32.mrb[7].mxu0 }
  0xff   :  { %v2041_v20 = vpop.eup %2040 }
 0x100   :  { %305 = vrot.lane.b32.xlu0 %v2041_v20, %s2158_s26 }
 0x101   :  { %v2043_v22 = vpop.eup %2042 }
 0x102   :  { %v299_v23 = vadd.f32 1.0, %v2043_v22  ;;  %v157_v22 = vadd.f32 %v2256_v13, %v156_v11 }
 0x104   :  { %2044 = vrcp.f32 %v299_v23 }
 0x10e   :  { %v2045_v24 = vpop.eup %2044 }
 0x10f   :  { %v303_v27 = vmul.f32 0.0, %v2045_v24 }
 0x172   :  { %v306_v25 = vpop.permute.xlu0 %305 }
 0x173   :  { %v308_v26 = vmul.f32 %v2045_v24, %v306_v25 }
 0x175   :  { %310 = vrot.lane.b32.xlu0 %v308_v26, %s2159_s3 }
 0x1e7   :  { %v311_v28 = vpop.permute.xlu0 %310 }
 0x1e8   :  { %v313_v29 = vadd.f32 %v311_v28, %v303_v27 }
 0x1ea   :  { %2046 = vtanh.f32 %v313_v29 }
 0x1f4   :  { %v2047_v30 = vpop.eup %2046 }
 0x1f5   :  { %316 = vrot.lane.b32.xlu1 %v2047_v30, %s2158_s26 }
 0x267   :  { %v317_v31 = vpop.permute.xlu1 %316 }
 0x268   :  { %v319_v32 = vmul.f32 %v2045_v24, %v317_v31 }
 0x26a   :  { %321 = vrot.lane.b32.xlu1 %v319_v32, %s2159_s3 }
 0x2dc   :  { %v322_v38 = vpop.permute.xlu1 %321 }
 0x2dd   :  { %1775 = vmatmul.mubr.msk.f32.vlgmr.msra.gmra.mrb[2].mxu1 %vm221_vm2, %v322_v38 }
 0x2de   :  { %1955 = vmatpush3.bf16.msra.mxu1 %v1954_v35  ;;  %1796 = vmatprep.mubr.msk.f32.mxu1 %vm2156_vm0, %v2157_v1 }
 0x2df   :  { %1956 = vmatprep.subr.bf16.mxu1 %v2155_v0 }
 0x2e2   :  { %1958 = vmatpush3.bf16.msra.mxu1 %v1957_v39  ;;  %v1966_v39 = vpack.c.bf16 %v198_v37, %v197_v36  ;;  %v207_v36 = vld [vmem:[#allocation2 + $0x90] sm:$0xff] }
 0x2e3   :  { %1965 = vmatprep.subr.bf16.mxu1 %v2155_v0 }
 0x2e5   :  { %1797 = vmatmul.mubr.msk.f32.vlgmr.msra.gmra.mrb[4].mxu1 %vm221_vm2, %v322_v38  ;;  %v199_v38 = vld [vmem:[#allocation2 + $0x50] sm:$0xff] }
 0x2e6   :  { %1818 = vmatprep.mubr.msk.f32.mxu1 %vm2156_vm0, %v2157_v1  ;;  %1967 = vmatpush3.bf16.msra.mxu1 %v1966_v39 }
 0x2e7   :  { %1968 = vmatprep.subr.bf16.mxu1 %v2155_v0 }
 0x3b0   :  { %v391_v41 = vpop.f32.mrb[2].mxu1 }
 0x3b1   :  { %v395_v42 = vadd.f32 %v391_v41, %v152_v40  ;;  %v1776_v43 = vpop.f32.mrb[3].mxu1  ;;  %v200_v40 = vld [vmem:[#allocation2 + $0x58] sm:$0xff] }
 0x3b2   :  { %v1969_v41 = vpack.c.bf16 %v200_v40, %v199_v38  ;;  %v208_v38 = vld [vmem:[#allocation2 + $0x98] sm:$0xff] }
 0x3b3   :  { %2048 = vtanh.f32 %v395_v42  ;;  %v1627_v47 = vmul.f32 -1.442695, %v395_v42  ;;  %v1993_v39 = vpack.c.bf16 %v208_v38, %v207_v36  ;;  %v182_v38 = vadd.f32 %v2315_v16, %v2256_v13 }
 0x3b4   :  { %1970 = vmatpush3.bf16.msra.mxu1 %v1969_v41 }
 0x3b5   :  { %2050 = vpow2.f32 %v1627_v47  ;;  %1977 = vmatprep.subr.bf16.mxu1 %v2155_v0 }
 0x3b8   :  { %v2272_v44 = vpop.f32.mrb[4].mxu1 }
 0x3b9   :  { %v1798_v45 = vpop.f32.mrb[5].mxu1 }
 0x3bd   :  { %v2049_v46 = vpop.eup %2048 }
 0x3be   :  { %405 = vrot.lane.b32.xlu0 %v2049_v46, %s2158_s26  ;;  %v162_v46 = vadd.f32 %v2309_v10, %v2256_v13 }
 0x3bf   :  { %v2051_v48 = vpop.eup %2050 }
 0x3c0   :  { %v399_v49 = vadd.f32 1.0, %v2051_v48 }
 0x3c2   :  { %2052 = vrcp.f32 %v399_v49 }
 0x3cc   :  { %v2053_v50 = vpop.eup %2052 }
 0x3cd   :  { %v403_v53 = vmul.f32 %v2053_v50, %v313_v29 }
 0x430   :  { %v406_v51 = vpop.permute.xlu0 %405 }
 0x431   :  { %v408_v52 = vmul.f32 %v2053_v50, %v406_v51 }
 0x433   :  { %410 = vrot.lane.b32.xlu1 %v408_v52, %s2159_s3 }
 0x4a5   :  { %v411_v54 = vpop.permute.xlu1 %410 }
 0x4a6   :  { %v2276_v55 = vadd.f32 %v411_v54, %v403_v53 }
 0x4a8   :  { %2054 = vtanh.f32 %v2276_v55 }
 0x4b2   :  { %v2055_v6 = vpop.eup %2054 }
 0x4b3   :  { %416 = vrot.lane.b32.xlu0 %v2055_v6, %s2158_s26  ;;  %v1981_v6 = vpack.c.bf16 %v204_v5, %v203_v3 }
 0x525   :  { %v417_v7 = vpop.permute.xlu0 %416 }
 0x526   :  { %v419_v9 = vmul.f32 %v2053_v50, %v417_v7 }
 0x528   :  { %421 = vrot.lane.b32.xlu1 %v419_v9, %s2159_s3 }
 0x59a   :  { %v422_v18 = vpop.permute.xlu1 %421 }
 0x59b   :  { %1786 = vmatmul.mubr.msk.f32.vlgmr.msra.gmra.mrb[8].mxu0 %vm221_vm2, %v422_v18 }
 0x59c   :  { %1961 = vmatpush3.bf16.msra.mxu0 %v2226_v8  ;;  %1807 = vmatprep.mubr.msk.f32.mxu0 %vm2156_vm0, %v2157_v1 }
 0x59d   :  { %1962 = vmatprep.subr.bf16.mxu0 %v2155_v0 }
 0x5a0   :  { %1964 = vmatpush3.bf16.msra.mxu0 %v2239_v12 }
 0x5a1   :  { %1971 = vmatprep.subr.bf16.mxu0 %v2155_v0 }
 0x5a3   :  { %1808 = vmatmul.mubr.msk.f32.vlgmr.msra.gmra.mrb[10].mxu0 %vm221_vm2, %v422_v18  ;;  %v167_v18 = vadd.f32 %v2256_v13, %v2313_v15 }
 0x5a4   :  { %1973 = vmatpush3.bf16.msra.mxu0 %v2226_v8  ;;  %1829 = vmatprep.mubr.msk.f32.mxu0 %vm2156_vm0, %v2157_v1 }
 0x5a5   :  { %1974 = vmatprep.subr.bf16.mxu0 %v2155_v0 }
 0x5a8   :  { %1976 = vmatpush3.bf16.msra.mxu0 %v2239_v12 }
 0x5a9   :  { %1983 = vmatprep.subr.bf16.mxu0 %v2155_v0 }
 0x66e   :  { %v491_v19 = vpop.f32.mrb[8].mxu0 }
 0x66f   :  { %v562_v20 = vadd.f32 %v2272_v44, %v491_v19  ;;  %v1787_v21 = vpop.f32.mrb[9].mxu0 }
 0x676   :  { %v631_v23 = vpop.f32.mrb[10].mxu0 }
 0x677   :  { %v635_v24 = vadd.f32 %v631_v23, %v157_v22  ;;  %v1809_v25 = vpop.f32.mrb[11].mxu0 }
 0x679   :  { %2056 = vtanh.f32 %v635_v24  ;;  %v1631_v27 = vmul.f32 -1.442695, %v635_v24 }
 0x67b   :  { %2058 = vpow2.f32 %v1631_v27 }
 0x683   :  { %v2057_v26 = vpop.eup %2056 }
 0x684   :  { %645 = vrot.lane.b32.xlu0 %v2057_v26, %s2158_s26 }
 0x685   :  { %v2059_v28 = vpop.eup %2058 }
 0x686   :  { %v639_v29 = vadd.f32 1.0, %v2059_v28 }
 0x688   :  { %2060 = vrcp.f32 %v639_v29 }
 0x692   :  { %v2061_v30 = vpop.eup %2060 }
 0x693   :  { %v643_v33 = vmul.f32 %v2061_v30, %v2276_v55 }
 0x6f6   :  { %v646_v31 = vpop.permute.xlu0 %645 }
 0x6f7   :  { %v648_v32 = vmul.f32 %v2061_v30, %v646_v31 }
 0x6f9   :  { %650 = vrot.lane.b32.xlu1 %v648_v32, %s2159_s3 }
 0x76b   :  { %v651_v34 = vpop.permute.xlu1 %650 }
 0x76c   :  { %v653_v35 = vadd.f32 %v651_v34, %v643_v33  ;;  %v205_v34 = vld [vmem:[#allocation2 + $0x80] sm:$0xff] }
 0x76e   :  { %2062 = vtanh.f32 %v653_v35 }
 0x778   :  { %v2063_v42 = vpop.eup %2062 }
 0x779   :  { %656 = vrot.lane.b32.xlu0 %v2063_v42, %s2158_s26 }
 0x7eb   :  { %v657_v43 = vpop.permute.xlu0 %656 }
 0x7ec   :  { %v659_v44 = vmul.f32 %v2061_v30, %v657_v43 }
 0x7ee   :  { %661 = vrot.lane.b32.xlu1 %v659_v44, %s2159_s3  ;;  %v172_v44 = vadd.f32 %v2311_v14, %v2256_v13 }
 0x860   :  { %v662_v45 = vpop.permute.xlu1 %661 }
 0x861   :  { %1819 = vmatmul.mubr.msk.f32.vlgmr.msra.gmra.mrb[6].mxu1 %vm221_vm2, %v662_v45  ;;  %1830 = vmatmul.mubr.msk.f32.vlgmr.msra.gmra.mrb[12].mxu0 %vm221_vm2, %v662_v45 }
 0x862   :  { %1985 = vmatpush3.bf16.msra.mxu0 %v2226_v8  ;;  %1840 = vmatprep.mubr.msk.f32.mxu1 %vm2156_vm0, %v2157_v1 }
 0x863   :  { %1986 = vmatprep.subr.bf16.mxu0 %v2155_v0  ;;  %1851 = vmatprep.mubr.msk.f32.mxu0 %vm2156_vm0, %v2157_v1 }
 0x864   :  { %1979 = vmatpush3.bf16.msra.mxu1 %v1978_v4 }
 0x865   :  { %1980 = vmatprep.subr.bf16.mxu1 %v2155_v0 }
 0x866   :  { %1988 = vmatpush3.bf16.msra.mxu0 %v2239_v12 }
 0x867   :  { %1995 = vmatprep.subr.bf16.mxu0 %v2155_v0 }
 0x868   :  { %1982 = vmatpush3.bf16.msra.mxu1 %v1981_v6 }
 0x869   :  { %1989 = vmatprep.subr.bf16.mxu1 %v2155_v0 }
 0x934   :  { %v731_v47 = vpop.f32.mrb[6].mxu1  ;;  %v802_v48 = vpop.f32.mrb[12].mxu0 }
 0x935   :  { %v735_v49 = vadd.f32 %v731_v47, %v562_v20  ;;  %v806_v50 = vadd.f32 %v802_v48, %v162_v46  ;;  %v1820_v51 = vpop.f32.mrb[7].mxu1  ;;  %v1831_v52 = vpop.f32.mrb[13].mxu0 }
 0x937   :  { %2064 = vtanh.f32 %v806_v50  ;;  %v1634_v54 = vmul.f32 -1.442695, %v806_v50 }
 0x939   :  { %2066 = vpow2.f32 %v1634_v54 }
 0x941   :  { %v2065_v53 = vpop.eup %2064 }
 0x942   :  { %816 = vrot.lane.b32.xlu0 %v2065_v53, %s2158_s26 }
 0x943   :  { %v2067_v55 = vpop.eup %2066 }
 0x944   :  { %v810_v56 = vadd.f32 1.0, %v2067_v55 }
 0x946   :  { %2068 = vrcp.f32 %v810_v56 }
 0x950   :  { %v2069_v57 = vpop.eup %2068 }
 0x951   :  { %v814_v60 = vmul.f32 %v2069_v57, %v653_v35  ;;  %v206_v35 = vld [vmem:[#allocation2 + $0x88] sm:$0xff] }
 0x952   :  { %v1990_v37 = vpack.c.bf16 %v206_v35, %v205_v34 }
 0x9b4   :  { %v817_v58 = vpop.permute.xlu0 %816 }
 0x9b5   :  { %v819_v59 = vmul.f32 %v2069_v57, %v817_v58 }
 0x9b7   :  { %821 = vrot.lane.b32.xlu1 %v819_v59, %s2159_s3 }
 0xa29   :  { %v822_v61 = vpop.permute.xlu1 %821 }
 0xa2a   :  { %v824_v62 = vadd.f32 %v822_v61, %v814_v60  ;;  %v209_v60 = vld [vmem:[#allocation2 + $0xa0] sm:$0xff]  ;;  %v210_v61 = vld [vmem:[#allocation2 + $0xa8] sm:$0xff] }
 0xa2b   :  { %v2002_v63 = vpack.c.bf16 %v210_v61, %v209_v60 }
 0xa2c   :  { %2070 = vtanh.f32 %v824_v62 }
 0xa36   :  { %v2071_v7 = vpop.eup %2070 }
 0xa37   :  { %827 = vrot.lane.b32.xlu0 %v2071_v7, %s2158_s26 }
 0xaa9   :  { %v828_v9 = vpop.permute.xlu0 %827 }
 0xaaa   :  { %v830_v10 = vmul.f32 %v2069_v57, %v828_v9  ;;  %v177_v9 = vadd.f32 %v2256_v13, %v2317_v17 }
 0xaac   :  { %832 = vrot.lane.b32.xlu1 %v830_v10, %s2159_s3 }
 0xb1e   :  { %v833_v11 = vpop.permute.xlu1 %832 }
 0xb1f   :  { %1841 = vmatmul.mubr.msk.f32.vlgmr.msra.gmra.mrb[8].mxu1 %vm221_vm2, %v833_v11  ;;  %1852 = vmatmul.mubr.msk.f32.vlgmr.msra.gmra.mrb[14].mxu0 %vm221_vm2, %v833_v11 }
 0xb20   :  { %1997 = vmatpush3.bf16.msra.mxu0 %v2226_v8  ;;  %1862 = vmatprep.mubr.msk.f32.mxu1 %vm2156_vm0, %v2157_v1 }
 0xb21   :  { %1998 = vmatprep.subr.bf16.mxu0 %v2155_v0  ;;  %1873 = vmatprep.mubr.msk.f32.mxu0 %vm2156_vm0, %v2157_v1 }
 0xb22   :  { %1991 = vmatpush3.bf16.msra.mxu1 %v1990_v37 }
 0xb23   :  { %1992 = vmatprep.subr.bf16.mxu1 %v2155_v0 }
 0xb24   :  { %2000 = vmatpush3.bf16.msra.mxu0 %v2239_v12 }
 0xb25   :  { %2007 = vmatprep.subr.bf16.mxu0 %v2155_v0 }
 0xb26   :  { %1994 = vmatpush3.bf16.msra.mxu1 %v1993_v39 }
 0xb27   :  { %2001 = vmatprep.subr.bf16.mxu1 %v2155_v0 }
 0xbf2   :  { %v902_v19 = vpop.f32.mrb[8].mxu1  ;;  %v973_v20 = vpop.f32.mrb[14].mxu0 }
 0xbf3   :  { %v906_v21 = vadd.f32 %v902_v19, %v735_v49  ;;  %v977_v22 = vadd.f32 %v973_v20, %v167_v18  ;;  %v1842_v23 = vpop.f32.mrb[9].mxu1  ;;  %v1853_v24 = vpop.f32.mrb[15].mxu0 }
 0xbf5   :  { %2072 = vtanh.f32 %v977_v22  ;;  %v1637_v26 = vmul.f32 -1.442695, %v977_v22 }
 0xbf7   :  { %2074 = vpow2.f32 %v1637_v26 }
 0xbff   :  { %v2073_v25 = vpop.eup %2072 }
 0xc00   :  { %987 = vrot.lane.b32.xlu0 %v2073_v25, %s2158_s26 }
 0xc01   :  { %v2075_v27 = vpop.eup %2074 }
 0xc02   :  { %v981_v28 = vadd.f32 1.0, %v2075_v27 }
 0xc04   :  { %2076 = vrcp.f32 %v981_v28 }
 0xc0e   :  { %v2077_v29 = vpop.eup %2076 }
 0xc0f   :  { %v985_v15 = vmul.f32 %v2077_v29, %v824_v62  ;;  %v211_v62 = vld [vmem:[#allocation2 + $0xb0] sm:$0xff] }
 0xc10   :  { %v2005_v3 = vpack.c.bf16 %v212_v2, %v211_v62  ;;  %v1648_v62 = vld [vmem:[%s2445_s5] ss:$0 sm:$0xff] }
 0xc72   :  { %v988_v30 = vpop.permute.xlu0 %987 }
 0xc73   :  { %v990_v31 = vmul.f32 %v2077_v29, %v988_v30  ;;  %v214_v30 = vld [vmem:[#allocation2 + $0xc8] sm:$0xff] }
 0xc75   :  { %992 = vrot.lane.b32.xlu1 %v990_v31, %s2159_s3  ;;  %v215_v31 = vld [vmem:[#allocation2 + $0xd0] sm:$0xff] }
 0xce7   :  { %v993_v32 = vpop.permute.xlu1 %992 }
 0xce8   :  { %v995_v33 = vadd.f32 %v993_v32, %v985_v15  ;;  %v216_v32 = vld [vmem:[#allocation2 + $0xd8] sm:$0xff] }
 0xcea   :  { %2078 = vtanh.f32 %v995_v33 }
 0xcf4   :  { %v2079_v40 = vpop.eup %2078 }
 0xcf5   :  { %998 = vrot.lane.b32.xlu0 %v2079_v40, %s2158_s26 }
 0xd67   :  { %v999_v41 = vpop.permute.xlu0 %998 }
 0xd68   :  { %v1001_v42 = vmul.f32 %v2077_v29, %v999_v41  ;;  %v213_v29 = vld [vmem:[#allocation2 + $0xc0] sm:$0xff] }
 0xd69   :  { %v2014_v15 = vpack.c.bf16 %v214_v30, %v213_v29 }
 0xd6a   :  { %1003 = vrot.lane.b32.xlu1 %v1001_v42, %s2159_s3 }
 0xddc   :  { %v1004_v43 = vpop.permute.xlu1 %1003 }
 0xddd   :  { %1863 = vmatmul.mubr.msk.f32.vlgmr.msra.gmra.mrb[10].mxu1 %vm221_vm2, %v1004_v43  ;;  %1874 = vmatmul.mubr.msk.f32.vlgmr.msra.gmra.mrb[16].mxu0 %vm221_vm2, %v1004_v43 }
 0xdde   :  { %2009 = vmatpush3.bf16.msra.mxu0 %v2226_v8  ;;  %1884 = vmatprep.mubr.msk.f32.mxu1 %vm2156_vm0, %v2157_v1 }
 0xddf   :  { %2010 = vmatprep.subr.bf16.mxu0 %v2155_v0  ;;  %1895 = vmatprep.mubr.msk.f32.mxu0 %vm2156_vm0, %v2157_v1 }
 0xde0   :  { %2003 = vmatpush3.bf16.msra.mxu1 %v2002_v63 }
 0xde1   :  { %2004 = vmatprep.subr.bf16.mxu1 %v2155_v0 }
 0xde2   :  { %2012 = vmatpush3.bf16.msra.mxu0 %v2239_v12 }
 0xde3   :  { %2019 = vmatprep.subr.bf16.mxu0 %v2155_v0 }
 0xde4   :  { %2006 = vmatpush3.bf16.msra.mxu1 %v2005_v3 }
 0xde5   :  { %2013 = vmatprep.subr.bf16.mxu1 %v2155_v0 }
 0xeb0   :  { %v1073_v45 = vpop.f32.mrb[10].mxu1  ;;  %v1144_v46 = vpop.f32.mrb[16].mxu0 }
 0xeb1   :  { %v1077_v47 = vadd.f32 %v1073_v45, %v906_v21  ;;  %v1148_v48 = vadd.f32 %v1144_v46, %v172_v44  ;;  %v1864_v49 = vpop.f32.mrb[11].mxu1  ;;  %v1875_v50 = vpop.f32.mrb[17].mxu0 }
 0xeb3   :  { %2080 = vtanh.f32 %v1148_v48  ;;  %v1640_v52 = vmul.f32 -1.442695, %v1148_v48 }
 0xeb5   :  { %2082 = vpow2.f32 %v1640_v52  ;;  %v217_v52 = vld [vmem:[#allocation2 + $0xe0] sm:$0xff] }
 0xebd   :  { %v2081_v51 = vpop.eup %2080 }
 0xebe   :  { %1158 = vrot.lane.b32.xlu0 %v2081_v51, %s2158_s26 }
 0xebf   :  { %v2083_v53 = vpop.eup %2082 }
 0xec0   :  { %v1152_v54 = vadd.f32 1.0, %v2083_v53  ;;  %v218_v53 = vld [vmem:[#allocation2 + $0xe8] sm:$0xff] }
 0xec2   :  { %2084 = vrcp.f32 %v1152_v54  ;;  %v219_v54 = vld [vmem:[#allocation2 + $0xf0] sm:$0xff] }
 0xecc   :  { %v2085_v55 = vpop.eup %2084 }
 0xecd   :  { %v1156_v14 = vmul.f32 %v2085_v55, %v995_v33  ;;  %v2017_v33 = vpack.c.bf16 %v216_v32, %v215_v31 }
 0xf30   :  { %v1159_v56 = vpop.permute.xlu0 %1158 }
 0xf31   :  { %v1161_v57 = vmul.f32 %v2085_v55, %v1159_v56  ;;  %v220_v56 = vld [vmem:[#allocation2 + $0xf8] sm:$0xff] }
 0xf33   :  { %1163 = vrot.lane.b32.xlu1 %v1161_v57, %s2159_s3  ;;  %v2029_v57 = vpack.c.bf16 %v220_v56, %v219_v54 }
 0xfa5   :  { %v1164_v58 = vpop.permute.xlu1 %1163 }
 0xfa6   :  { %v1166_v59 = vadd.f32 %v1164_v58, %v1156_v14 }
 0xfa8   :  { %2086 = vtanh.f32 %v1166_v59 }
 0xfb2   :  { %v2087_v4 = vpop.eup %2086 }
 0xfb3   :  { %1169 = vrot.lane.b32.xlu0 %v2087_v4, %s2158_s26 }
0x1025   :  { %v1170_v5 = vpop.permute.xlu0 %1169 }
0x1026   :  { %v1172_v6 = vmul.f32 %v2085_v55, %v1170_v5  ;;  %v2026_v55 = vpack.c.bf16 %v218_v53, %v217_v52 }
0x1028   :  { %1174 = vrot.lane.b32.xlu1 %v1172_v6, %s2159_s3 }
0x109a   :  { %v1175_v7 = vpop.permute.xlu1 %1174 }
0x109b   :  { %1885 = vmatmul.mubr.msk.f32.vlgmr.msra.gmra.mrb[12].mxu1 %vm221_vm2, %v1175_v7  ;;  %1896 = vmatmul.mubr.msk.f32.vlgmr.msra.gmra.mrb[18].mxu0 %vm221_vm2, %v1175_v7 }
0x109c   :  { %2021 = vmatpush3.bf16.msra.mxu0 %v2226_v8  ;;  %1906 = vmatprep.mubr.msk.f32.mxu1 %vm2156_vm0, %v2157_v1 }
0x109d   :  { %2022 = vmatprep.subr.bf16.mxu0 %v2155_v0  ;;  %1917 = vmatprep.mubr.msk.f32.mxu0 %vm2156_vm0, %v2157_v1 }
0x109e   :  { %2015 = vmatpush3.bf16.msra.mxu1 %v2014_v15 }
0x109f   :  { %2016 = vmatprep.subr.bf16.mxu1 %v2155_v0 }
0x10a0   :  { %2024 = vmatpush3.bf16.msra.mxu0 %v2239_v12 }
0x10a2   :  { %2018 = vmatpush3.bf16.msra.mxu1 %v2017_v33 }
0x10a3   :  { %2025 = vmatprep.subr.bf16.mxu1 %v2155_v0 }
0x116e   :  { %v1244_v10 = vpop.f32.mrb[12].mxu1  ;;  %v1315_v11 = vpop.f32.mrb[18].mxu0 }
0x116f   :  { %v1248_v18 = vadd.f32 %v1244_v10, %v1077_v47  ;;  %v1319_v19 = vadd.f32 %v1315_v11, %v177_v9  ;;  %v1886_v20 = vpop.f32.mrb[13].mxu1  ;;  %v1897_v21 = vpop.f32.mrb[19].mxu0 }
0x1171   :  { %2088 = vtanh.f32 %v1319_v19  ;;  %v1643_v22 = vmul.f32 -1.442695, %v1319_v19 }
0x1173   :  { %2090 = vpow2.f32 %v1643_v22 }
0x117b   :  { %v2089_v8 = vpop.eup %2088 }
0x117c   :  { %1329 = vrot.lane.b32.xlu0 %v2089_v8, %s2158_s26 }
0x117d   :  { %v2091_v23 = vpop.eup %2090 }
0x117e   :  { %v1323_v24 = vadd.f32 1.0, %v2091_v23 }
0x1180   :  { %2092 = vrcp.f32 %v1323_v24 }
0x118a   :  { %v2093_v25 = vpop.eup %2092 }
0x118b   :  { %v1327_v17 = vmul.f32 %v2093_v25, %v1166_v59 }
0x11ee   :  { %v1330_v12 = vpop.permute.xlu0 %1329 }
0x11ef   :  { %v1332_v26 = vmul.f32 %v2093_v25, %v1330_v12 }
0x11f1   :  { %1334 = vrot.lane.b32.xlu1 %v1332_v26, %s2159_s3 }
0x1263   :  { %v1335_v27 = vpop.permute.xlu1 %1334 }
0x1264   :  { %v1337_v28 = vadd.f32 %v1335_v27, %v1327_v17 }
0x1266   :  { %2094 = vtanh.f32 %v1337_v28 }
0x1270   :  { %v2095_v34 = vpop.eup %2094 }
0x1271   :  { %1340 = vrot.lane.b32.xlu0 %v2095_v34, %s2158_s26 }
0x12e3   :  { %v1341_v35 = vpop.permute.xlu0 %1340 }
0x12e4   :  { %v1343_v36 = vmul.f32 %v2093_v25, %v1341_v35 }
0x12e6   :  { %1345 = vrot.lane.b32.xlu1 %v1343_v36, %s2159_s3 }
0x1358   :  { %v1346_v37 = vpop.permute.xlu1 %1345 }
0x1359   :  { %1907 = vmatmul.mubr.msk.f32.vlgmr.msra.gmra.mrb[14].mxu1 %vm221_vm2, %v1346_v37  ;;  %1918 = vmatmul.mubr.msk.f32.vlgmr.msra.gmra.mrb[20].mxu0 %vm221_vm2, %v1346_v37 }
0x135a   :  { %1928 = vmatprep.mubr.msk.f32.mxu1 %vm2156_vm0, %v2157_v1  ;;  %2027 = vmatpush3.bf16.msra.mxu1 %v2026_v55 }
0x135b   :  { %2028 = vmatprep.subr.bf16.mxu1 %v2155_v0 }
0x135e   :  { %2030 = vmatpush3.bf16.msra.mxu1 %v2029_v57 }
0x142c   :  { %v1415_v39 = vpop.f32.mrb[14].mxu1  ;;  %v1486_v40 = vpop.f32.mrb[20].mxu0 }
0x142d   :  { %v1419_v41 = vadd.f32 %v1415_v39, %v1248_v18  ;;  %v1490_v42 = vadd.f32 %v1486_v40, %v182_v38  ;;  %v1908_v43 = vpop.f32.mrb[15].mxu1  ;;  %v1919_v44 = vpop.f32.mrb[21].mxu0 }
0x142f   :  { %2096 = vtanh.f32 %v1490_v42  ;;  %v1646_v46 = vmul.f32 -1.442695, %v1490_v42 }
0x1431   :  { %2098 = vpow2.f32 %v1646_v46 }
0x1439   :  { %v2097_v45 = vpop.eup %2096 }
0x143a   :  { %1500 = vrot.lane.b32.xlu0 %v2097_v45, %s2158_s26 }
0x143b   :  { %v2099_v47 = vpop.eup %2098 }
0x143c   :  { %v1494_v48 = vadd.f32 1.0, %v2099_v47 }
0x143e   :  { %2100 = vrcp.f32 %v1494_v48 }
0x1448   :  { %v2101_v49 = vpop.eup %2100 }
0x1449   :  { %v1498_v13 = vmul.f32 %v2101_v49, %v1337_v28 }
0x14ac   :  { %v1501_v1 = vpop.permute.xlu0 %1500 }
0x14ad   :  { %v1503_v50 = vmul.f32 %v2101_v49, %v1501_v1 }
0x14af   :  { %1505 = vrot.lane.b32.xlu1 %v1503_v50, %s2159_s3 }
0x1521   :  { %v1506_v16 = vpop.permute.xlu1 %1505 }
0x1522   :  { %v1508_v51 = vadd.f32 %v1506_v16, %v1498_v13 }
0x1524   :  { %2102 = vtanh.f32 %v1508_v51 }
0x152e   :  { %v2103_v14 = vpop.eup %2102 }
0x152f   :  { %1511 = vrot.lane.b32.xlu0 %v2103_v14, %s2158_s26 }
0x15a1   :  { %v1512_v58 = vpop.permute.xlu0 %1511 }
0x15a2   :  { %v1514_v59 = vmul.f32 %v2101_v49, %v1512_v58 }
0x15a4   :  { %1516 = vrot.lane.b32.xlu1 %v1514_v59, %s2159_s3 }
0x1616   :  { %v1517_v60 = vpop.permute.xlu1 %1516 }
0x1617   :  { %1929 = vmatmul.mubr.msk.f32.vlgmr.msra.gmra.mrb[16].mxu1 %vm221_vm2, %v1517_v60 }
0x16ea   :  { %v1586_v61 = vpop.f32.mrb[16].mxu1 }
0x16eb   :  { %v1590_v63 = vadd.f32 %v1586_v61, %v1419_v41  ;;  %v1930_v2 = vpop.f32.mrb[17].mxu1 }
0x16ed   :  { %v1598_v0 = vadd.f32 %v1648_v62, %v1590_v63 }
0x16ef   :  { %v1599_v3 = vmax.f32 %v1598_v0, 0.0 }
0x16f1   :  { %1600 = vst [vmem:[#allocation5] sm:$0xff] %v1599_v3 }
0x16f2   :  { %2137 = shalt.err (!%p2134_p12)
}
0x16f3   :  { %s2138_s20 = scalar_lea.hbm %s2446_s6, 128 }
0x16f4   :  { %p2139_p13 = scmp.ne.s32.totalorder %s2446_s6, %s2138_s20  ;;  %p2142_p0 = scmp.lt.u32.totalorder %s2138_s20, %s2446_s6 }
0x16f6   :  { %p2144_p1 = pnand %p2142_p0, %p2139_p13 }
0x16f8   :  { %2147 = shalt.err (!%p2144_p1)
}
0x16f9   :  { %1610 = dma.vmem_to_hbm [thread:$0]  %s1608_s16, 128, %s2446_s6, [#allocation4]  }
0x16fa   :  { %2150 = dma.done.wait [#allocation4], 128  }
0x16fb   :  { %2151 = vsyncadd [#allocation4], 4294967168 }
0x16fc   :  { %1614 = vsyncpa [#allocation3], 1 }
0x16fd   :  { %1615 = vsyncpa [#allocation4], 1 }

</bundles_post_ra>
